<compile_context>
chip_gen: v5e
topology: v5e:2x2
jax: 0.10.0
libtpu: 0.0.40
codegen_flags: <defaults>
</compile_context>

<pallas_src>
import jax
import jax.numpy as jnp
from jax.experimental import pallas as pl
from jax.experimental.pallas import tpu as pltpu


def _scaled_conv1x1_kernel(x_ref, s_ref, w_ref, o_ref):
    # x_ref: (Cin, HW)  s_ref: (1, Cin)  w_ref: (Cout, Cin)  o_ref: (Cout, HW)
    # Fold the per-input-channel scale into the weight:
    #   (w * s) @ x  ==  w @ (diag(s) @ x)  ==  conv1x1(x * s)
    w_scaled = w_ref[...] * s_ref[...]  # (Cout, Cin), tiny VPU broadcast multiply
    o_ref[...] = jnp.dot(
        w_scaled, x_ref[...], preferred_element_type=jnp.float32
    ).astype(o_ref.dtype)


def m_forward(x84, x79, weight):
    """x84: (1, Cin, 1, 1), x79: (1, Cin, H, W), weight: (Cout, Cin, 1, 1).

    Returns (1, Cout, H, W), matching PyTorch NCHW semantics.
    Batch must be 1 (true for this module); larger N would need a batch grid axis.
    """
    n, cin, h, w = x79.shape
    assert n == 1
    cout = weight.shape[0]
    hw = h * w

    # Pure reshapes, no data movement: N==1 NCHW is already channels-major.
    x_c_hw = x79.reshape(cin, hw)          # (Cin, HW)
    scale = x84.reshape(1, cin)            # (1, Cin)
    w_mat = weight.reshape(cout, cin)      # (Cout, Cin)

    itemsize = jnp.dtype(x79.dtype).itemsize
    cost = pl.CostEstimate(
        flops=2 * hw * cin * cout,
        transcendentals=0,
        bytes_accessed=(cin * hw + cout * cin + cin + cout * hw) * itemsize,
    )

    out_c_hw = pl.pallas_call(
        _scaled_conv1x1_kernel,
        out_shape=jax.ShapeDtypeStruct((cout, hw), x79.dtype),
        in_specs=[
            pl.BlockSpec(memory_space=pltpu.MemorySpace.VMEM),
            pl.BlockSpec(memory_space=pltpu.MemorySpace.VMEM),
            pl.BlockSpec(memory_space=pltpu.MemorySpace.VMEM),
        ],
        out_specs=pl.BlockSpec(memory_space=pltpu.MemorySpace.VMEM),
        cost_estimate=cost,
    )(x_c_hw, scale, w_mat)

    # (Cout, H*W) -> (1, Cout, H, W): plain reshape, no transpose.
    return out_c_hw.reshape(1, cout, h, w)


if __name__ == "__main__":
    key = jax.random.PRNGKey(0)
    k1, k2, k3 = jax.random.split(key, 3)

    C_IN, C_OUT, H, W = 144, 48, 28, 28

    x79 = jax.random.normal(k1, (1, C_IN, H, W), dtype=jnp.float32)
    x84 = jax.random.normal(k2, (1, C_IN, 1, 1), dtype=jnp.float32)
    # Deterministic synthetic conv weight (Cout, Cin, 1, 1), like nn.Conv2d.
    weight = jax.random.normal(k3, (C_OUT, C_IN, 1, 1), dtype=jnp.float32) * 0.05

    out = m_forward(x84, x79, weight)
    out = jax.block_until_ready(out)

    # Reference check against plain-JAX scale + 1x1 conv.
    x85 = x84 * x79
    ref = jax.lax.conv_general_dilated(
        x85, weight, window_strides=(1, 1), padding="VALID",
        dimension_numbers=("NCHW", "OIHW", "NCHW"),
    )
    assert out.shape == (1, C_OUT, H, W)
    assert jnp.allclose(out, ref, atol=1e-3, rtol=1e-3)

    print("KERNEL_OK")
</pallas_src>

<mosaic_0001>
module attributes {stable_mosaic.version = 11 : i64} {
  func.func @_scaled_conv1x1_kernel(%arg0: memref<144x784xf32, #tpu.memory_space<vmem>>, %arg1: memref<1x144xf32, #tpu.memory_space<vmem>>, %arg2: memref<48x144xf32, #tpu.memory_space<vmem>>, %arg3: memref<48x784xf32, #tpu.memory_space<vmem>>) attributes {dimension_semantics = [], scalar_prefetch = 0 : i64, scratch_operands = 0 : i64, tpu.core_type = #tpu.core_type<tc>} {
    %c0 = arith.constant 0 : index
    %c0_0 = arith.constant 0 : index
    %0 = vector.load %arg2[%c0, %c0_0] : memref<48x144xf32, #tpu.memory_space<vmem>>, vector<48x144xf32>
    %c0_1 = arith.constant 0 : index
    %c0_2 = arith.constant 0 : index
    %1 = vector.load %arg1[%c0_1, %c0_2] : memref<1x144xf32, #tpu.memory_space<vmem>>, vector<1x144xf32>
    %2 = vector.broadcast %1 : vector<1x144xf32> to vector<48x144xf32>
    %3 = arith.mulf %0, %2 : vector<48x144xf32>
    %c0_3 = arith.constant 0 : index
    %c0_4 = arith.constant 0 : index
    %4 = vector.load %arg0[%c0_3, %c0_4] : memref<144x784xf32, #tpu.memory_space<vmem>>, vector<144x784xf32>
    %cst = arith.constant dense<0.000000e+00> : vector<48x784xf32>
    %5 = tpu.matmul %3, %4, %cst {dimension_numbers = #tpu.dot_dimension_numbers<[1], [0], [0], [1], [0, 0, 1, 1], [], []>} : vector<48x144xf32>, vector<144x784xf32>, vector<48x784xf32> -> vector<48x784xf32>
    %c0_5 = arith.constant 0 : index
    %c0_6 = arith.constant 0 : index
    %6 = vector.load %arg3[%c0_5, %c0_6] : memref<48x784xf32, #tpu.memory_space<vmem>>, vector<48x784xf32>
    tpu.vector_store %arg3[%c0_5, %c0_6], %5 {strides = array<i32>} : memref<48x784xf32, #tpu.memory_space<vmem>>, vector<48x784xf32>,
    return
  }
}

</mosaic_0001>

<bundles_post_ra>
// kernel: tpu_custom_call.1
= control target key start
LH: loop header
LB: loop body
LE: loop exit
PB: predicated region body
PF: predicated region fallthrough
CT: control target
= control target key end

     0   :  { %8 = vsyncpa [#allocation3], 0  ;;  %s1190_s0 = inlined_call_operand.hbm [shape: f32[144,784], index: 0, kind: input, shape index: {}]   ;;  %s1191_s1 = inlined_call_operand.hbm [shape: f32[1,144], index: 1, kind: input, shape index: {}]   ;;  %s1192_s2 = inlined_call_operand.hbm [shape: f32[48,144], index: 2, kind: input, shape index: {}]   ;;  %s1193_s3 = inlined_call_operand.hbm [shape: f32[48,784], index: 3, kind: output, shape index: {}]  }
   0x1   :  { %9 = vsyncpa [#allocation6], 0  ;;  %s29_s14 = sshll.u32 %s1191_s1, 4  ;;  %s30_s14 = int_to_ptr.hbm [resolvable:$true] %s29_s14 }
   0x2   :  { %10 = vsyncpa [#allocation4], 0  ;;  %s957_s15 = smov [#allocation5]   ;;  %s15_s19 = sshll.u32 %s1190_s0, 4  ;;  %s16_s19 = int_to_ptr.hbm [resolvable:$true] %s15_s19 }
   0x3   :  { %s31_s16 = sshll.u32 %s957_s15, 4  ;;  %s958_s20 = smov [#allocation2]   ;;  %s32_s16 = int_to_ptr.vmem [resolvable:$true] %s31_s16 }
   0x4   :  { %34 = dma.hbm_to_vmem [thread:$0]  %s30_s14, 32, %s32_s16, [#allocation6]  }
   0x5   :  { %s17_s21 = sshll.u32 %s958_s20, 4  ;;  %s959_s22 = smov 896   ;;  %s18_s21 = int_to_ptr.vmem [resolvable:$true] %s17_s21 }
   0x6   :  { %s960_s23 = smov 56   ;;  %s39_s25 = sshll.u32 %s1192_s2, 4  ;;  %s40_s25 = int_to_ptr.hbm [resolvable:$true] %s39_s25 }
   0x7   :  { %23 = dma.hbm_to_vmem [thread:$0]  %s16_s19, 16128, %s18_s21, [#allocation3], %s959_s22, %s959_s22, %s960_s23  }
   0x8   :  { %s961_s26 = smov [#allocation7]   ;;  %s962_s0 = smov 256  }
   0x9   :  { %s41_s27 = sshll.u32 %s961_s26, 4  ;;  %s963_s28 = smov 16   ;;  %s42_s27 = int_to_ptr.vmem [resolvable:$true] %s41_s27 }
   0xa   :  { %47 = dma.hbm_to_vmem [thread:$0]  %s40_s25, 1536, %s42_s27, [#allocation6], %s962_s0, %s962_s0, %s963_s28  }
   0xb   :  { %951 = dma.done.wait [#allocation3], 16128  }
   0xc   :  { %952 = vsyncadd [#allocation3], 4294951168 }
   0xd   :  { %953 = dma.done.wait [#allocation6], 1568  }
   0xe   :  { %954 = vsyncadd [#allocation6], 4294965728  ;;  %v195_v0 = vld [vmem:[#allocation2 + $0x348] sm:$0xff]  ;;  %v196_v1 = vld [vmem:[#allocation2 + $0x350] sm:$0xff]  ;;  %vm216_vm0 = vcmask 130048   ;;  %s964_s2 = smov [#allocation8]  }
   0xf   :  { %v209_v2 = vld [vmem:[#allocation2 + $0x3b8] sm:$0xff]  ;;  %235 = vmatpush.msra.mxu0 %v195_v0  ;;  %305 = vmatpush.msra.mxu2 %v196_v1  ;;  %v997_v3 = vld [vmem:[#allocation2 + $0x3c0] sm:$0xff]  ;;  %v188_v4 = vld [vmem:[#allocation2 + $0x310] sm:$0xff]  ;;  %s771_s29 = sshll.u32 %s964_s2, 4  ;;  %s773_s5 = sshll.u32 %s1193_s3, 4  ;;  %s772_s29 = int_to_ptr.vmem [resolvable:$true] %s771_s29  ;;  %s774_s5 = int_to_ptr.hbm [resolvable:$true] %s773_s5 }
  0x10   :  { %v189_v5 = vld [vmem:[#allocation2 + $0x318] sm:$0xff]  ;;  %284 = vmatpush.msra.mxu1 %v209_v2  ;;  %829 = vmatpush.msra.mxu3 %v997_v3  ;;  %v202_v6 = vld [vmem:[#allocation2 + $0x380] sm:$0xff]  ;;  %v1000_v7 = vld [vmem:[#allocation2 + $0x388] sm:$0xff] }
  0x11   :  { %v181_v8 = vld [vmem:[#allocation2 + $0x2d8] sm:$0xff]  ;;  %236 = vmatpush.msra.mxu0 %v188_v4  ;;  %306 = vmatpush.msra.mxu2 %v189_v5  ;;  %v1002_v10 = vld [vmem:[#allocation5] sm:$0x3]  ;;  %v182_v11 = vld [vmem:[#allocation2 + $0x2e0] sm:$0xff] }
  0x12   :  { %v61_v9 = vld [vmem:[#allocation7 + $0x8] sm:$0xff]  ;;  %285 = vmatpush.msra.mxu1 %v202_v6  ;;  %830 = vmatpush.msra.mxu3 %v1000_v7  ;;  %v1006_v12 = vperm.slane %v1002_v10, 1  ;;  %v63_v13 = vld [vmem:[#allocation7 + $0x18] sm:$0xff]  ;;  %v1033_v53 = vperm.slane %v1002_v10, 0  ;;  %v60_v57 = vld [vmem:[#allocation7] sm:$0xff] }
  0x13   :  { %v211_v14 = vld [vmem:[#allocation2 + $0x3c8] sm:$0xff]  ;;  %v174_v15 = vld [vmem:[#allocation2 + $0x2a0] sm:$0xff]  ;;  %237 = vmatpush.msra.mxu0 %v181_v8  ;;  %307 = vmatpush.msra.mxu2 %v182_v11  ;;  %v168_v20 = vld [vmem:[#allocation2 + $0x270] sm:$0xff] }
  0x14   :  { %v175_v16 = vld [vmem:[#allocation2 + $0x2a8] sm:$0xff]  ;;  %v1009_v17 = vmul.f32 %v1006_v12, %v61_v9  ;;  %v1012_v18 = vmul.f32 %v1006_v12, %v63_v13  ;;  %424 = vmatpush.msrb.mxu3 %v211_v14  ;;  %v197_v21 = vld [vmem:[#allocation2 + $0x358] sm:$0xff]  ;;  %v160_v22 = vld [vmem:[#allocation2 + $0x230] sm:$0xff]  ;;  %v1039_v62 = vmul.f32 %v1033_v53, %v60_v57 }
  0x15   :  { %v167_v19 = vld [vmem:[#allocation2 + $0x268] sm:$0xff]  ;;  %238 = vmatpush.msra.mxu0 %v174_v15  ;;  %308 = vmatpush.msra.mxu2 %v175_v16  ;;  %v161_v23 = vld [vmem:[#allocation2 + $0x238] sm:$0xff]  ;;  %v190_v25 = vld [vmem:[#allocation2 + $0x320] sm:$0xff] }
  0x16   :  { %787 = vmatmul.msk.f32.vlgmr.msra.gmra.mxu1 %vm216_vm0, %v1009_v17  ;;  %794 = vmatmul.msk.f32.vlgmr.msra.gmra.mxu3 %vm216_vm0, %v1012_v18  ;;  %v65_v24 = vld [vmem:[#allocation7 + $0x28] sm:$0xff]  ;;  %v183_v28 = vld [vmem:[#allocation2 + $0x2e8] sm:$0xff]  ;;  %v204_v32 = vld [vmem:[#allocation2 + $0x390] sm:$0xff] }
  0x17   :  { %239 = vmatpush.msra.mxu0 %v167_v19  ;;  %309 = vmatpush.msra.mxu2 %v168_v20  ;;  %v153_v26 = vld [vmem:[#allocation2 + $0x1f8] sm:$0xff]  ;;  %v154_v27 = vld [vmem:[#allocation2 + $0x200] sm:$0xff]  ;;  %v1019_v29 = vmul.f32 %v1006_v12, %v65_v24  ;;  %v147_v31 = vld [vmem:[#allocation2 + $0x1c8] sm:$0xff] }
  0x18   :  { %375 = vmatpush.msrb.mxu1 %v197_v21  ;;  %v146_v30 = vld [vmem:[#allocation2 + $0x1c0] sm:$0xff]  ;;  %v139_v33 = vld [vmem:[#allocation2 + $0x188] sm:$0xff]  ;;  %v140_v34 = vld [vmem:[#allocation2 + $0x190] sm:$0xff]  ;;  %425 = vmatpush.msrb.mxu3 %v204_v32 }
  0x19   :  { %240 = vmatpush.msra.mxu0 %v160_v22  ;;  %310 = vmatpush.msra.mxu2 %v161_v23  ;;  %v176_v35 = vld [vmem:[#allocation2 + $0x2b0] sm:$0xff]  ;;  %v133_v37 = vld [vmem:[#allocation2 + $0x158] sm:$0xff]  ;;  %v126_v41 = vld [vmem:[#allocation2 + $0x120] sm:$0xff] }
  0x1a   :  { %376 = vmatpush.msrb.mxu1 %v190_v25  ;;  %v132_v36 = vld [vmem:[#allocation2 + $0x150] sm:$0xff]  ;;  %v169_v39 = vld [vmem:[#allocation2 + $0x278] sm:$0xff]  ;;  %v162_v42 = vld [vmem:[#allocation2 + $0x240] sm:$0xff] }
  0x1b   :  { %241 = vmatpush.msra.mxu0 %v153_v26  ;;  %311 = vmatpush.msra.mxu2 %v154_v27  ;;  %v67_v38 = vld [vmem:[#allocation7 + $0x38] sm:$0xff]  ;;  %v125_v40 = vld [vmem:[#allocation2 + $0x118] sm:$0xff]  ;;  %v118_v44 = vld [vmem:[#allocation2 + $0xe0] sm:$0xff] }
  0x1c   :  { %377 = vmatpush.msrb.mxu1 %v183_v28  ;;  %v1026_v43 = vmul.f32 %v1006_v12, %v67_v38  ;;  %v119_v45 = vld [vmem:[#allocation2 + $0xe8] sm:$0xff]  ;;  %v213_v46 = vld [vmem:[#allocation2 + $0x3d8] sm:$0xff]  ;;  %v112_v48 = vld [vmem:[#allocation2 + $0xb0] sm:$0xff] }
  0x1d   :  { %242 = vmatpush.msra.mxu0 %v146_v30  ;;  %312 = vmatpush.msra.mxu2 %v147_v31  ;;  %v111_v47 = vld [vmem:[#allocation2 + $0xa8] sm:$0xff]  ;;  %v104_v50 = vld [vmem:[#allocation2 + $0x70] sm:$0xff]  ;;  %v105_v51 = vld [vmem:[#allocation2 + $0x78] sm:$0xff] }
  0x1e   :  { %788 = vmatmul.msk.f32.gmra.mxu1 %vm216_vm0, %v1012_v18  ;;  %795 = vmatmul.msk.f32.gmra.mxu3 %vm216_vm0, %v1019_v29  ;;  %v155_v49 = vld [vmem:[#allocation2 + $0x208] sm:$0xff]  ;;  %v69_v52 = vld [vmem:[#allocation7 + $0x48] sm:$0xff]  ;;  %v148_v54 = vld [vmem:[#allocation2 + $0x1d0] sm:$0xff] }
  0x1f   :  { %243 = vmatpush.msra.mxu0 %v139_v33  ;;  %313 = vmatpush.msra.mxu2 %v140_v34  ;;  %v97_v55 = vld [vmem:[#allocation2 + $0x38] sm:$0xff]  ;;  %v98_v56 = vld [vmem:[#allocation2 + $0x40] sm:$0xff]  ;;  %v1036_v59 = vmul.f32 %v1006_v12, %v69_v52  ;;  %v91_v61 = vld [vmem:[#allocation2 + $0x8] sm:$0xff] }
  0x20   :  { %378 = vmatpush.msrb.mxu1 %v176_v35  ;;  %564 = vmatpush.msra.mxu3 %v213_v46  ;;  %v141_v58 = vld [vmem:[#allocation2 + $0x198] sm:$0xff]  ;;  %v90_v60 = vld [vmem:[#allocation2] sm:$0xff]  ;;  %v71_v1 = vld [vmem:[#allocation7 + $0x58] sm:$0xff] }
  0x21   :  { %244 = vmatpush.msra.mxu0 %v132_v36  ;;  %314 = vmatpush.msra.mxu2 %v133_v37  ;;  %v134_v63 = vld [vmem:[#allocation2 + $0x160] sm:$0xff]  ;;  %v127_v2 = vld [vmem:[#allocation2 + $0x128] sm:$0xff]  ;;  %v120_v6 = vld [vmem:[#allocation2 + $0xf0] sm:$0xff]  ;;  %v1049_v8 = vmul.f32 %v1006_v12, %v71_v1 }
  0x22   :  { %379 = vmatpush.msrb.mxu1 %v169_v39  ;;  %v198_v0 = vld [vmem:[#allocation2 + $0x360] sm:$0xff]  ;;  %v191_v5 = vld [vmem:[#allocation2 + $0x328] sm:$0xff]  ;;  %v184_v9 = vld [vmem:[#allocation2 + $0x2f0] sm:$0xff] }
  0x23   :  { %245 = vmatpush.msra.mxu0 %v125_v40  ;;  %315 = vmatpush.msra.mxu2 %v126_v41  ;;  %v62_v4 = vld [vmem:[#allocation7 + $0x10] sm:$0xff]  ;;  %v113_v11 = vld [vmem:[#allocation2 + $0xb8] sm:$0xff]  ;;  %v92_v20 = vld [vmem:[#allocation2 + $0x10] sm:$0xff] }
  0x24   :  { %380 = vmatpush.msrb.mxu1 %v162_v42  ;;  %v1053_v10 = vmul.f32 %v1033_v53, %v62_v4  ;;  %v206_v12 = vld [vmem:[#allocation2 + $0x3a0] sm:$0xff]  ;;  %v64_v14 = vld [vmem:[#allocation7 + $0x20] sm:$0xff]  ;;  %v99_v15 = vld [vmem:[#allocation2 + $0x48] sm:$0xff] }
  0x25   :  { %246 = vmatpush.msra.mxu0 %v118_v44  ;;  %316 = vmatpush.msra.mxu2 %v119_v45  ;;  %v170_v13 = vld [vmem:[#allocation2 + $0x280] sm:$0xff]  ;;  %v163_v16 = vld [vmem:[#allocation2 + $0x248] sm:$0xff]  ;;  %v1062_v19 = vmul.f32 %v1033_v53, %v64_v14  ;;  %v156_v21 = vld [vmem:[#allocation2 + $0x210] sm:$0xff] }
  0x26   :  { %789 = vmatmul.msk.f32.gmra.mxu1 %vm216_vm0, %v1019_v29  ;;  %796 = vmatmul.msk.f32.gmra.mxu3 %vm216_vm0, %v1026_v43  ;;  %v199_v22 = vld [vmem:[#allocation2 + $0x368] sm:$0xff]  ;;  %v149_v23 = vld [vmem:[#allocation2 + $0x1d8] sm:$0xff]  ;;  %v192_v25 = vld [vmem:[#allocation2 + $0x330] sm:$0xff] }
  0x27   :  { %247 = vmatpush.msra.mxu0 %v111_v47  ;;  %317 = vmatpush.msra.mxu2 %v112_v48  ;;  %v66_v24 = vld [vmem:[#allocation7 + $0x30] sm:$0xff]  ;;  %v185_v27 = vld [vmem:[#allocation2 + $0x2f8] sm:$0xff]  ;;  %v212_v32 = vld [vmem:[#allocation2 + $0x3d0] sm:$0xff] }
  0x28   :  { %381 = vmatpush.msrb.mxu1 %v155_v49  ;;  %565 = vmatpush.msra.mxu3 %v206_v12  ;;  %v142_v26 = vld [vmem:[#allocation2 + $0x1a0] sm:$0xff]  ;;  %v1071_v28 = vmul.f32 %v1033_v53, %v66_v24  ;;  %v135_v30 = vld [vmem:[#allocation2 + $0x168] sm:$0xff]  ;;  %v128_v33 = vld [vmem:[#allocation2 + $0x130] sm:$0xff] }
  0x29   :  { %248 = vmatpush.msra.mxu0 %v104_v50  ;;  %318 = vmatpush.msra.mxu2 %v105_v51  ;;  %v178_v31 = vld [vmem:[#allocation2 + $0x2c0] sm:$0xff]  ;;  %v171_v34 = vld [vmem:[#allocation2 + $0x288] sm:$0xff]  ;;  %v68_v35 = vld [vmem:[#allocation7 + $0x40] sm:$0xff] }
  0x2a   :  { %382 = vmatpush.msrb.mxu1 %v148_v54  ;;  %v205_v36 = vld [vmem:[#allocation2 + $0x398] sm:$0xff]  ;;  %v164_v38 = vld [vmem:[#allocation2 + $0x250] sm:$0xff]  ;;  %v1079_v39 = vmul.f32 %v1033_v53, %v68_v35  ;;  %v114_v40 = vld [vmem:[#allocation2 + $0xc0] sm:$0xff] }
  0x2b   :  { %249 = vmatpush.msra.mxu0 %v97_v55  ;;  %319 = vmatpush.msra.mxu2 %v98_v56  ;;  %v121_v37 = vld [vmem:[#allocation2 + $0xf8] sm:$0xff]  ;;  %v215_v42 = vld [vmem:[#allocation2 + $0x3e8] sm:$0xff]  ;;  %v150_v45 = vld [vmem:[#allocation2 + $0x1e0] sm:$0xff] }
  0x2c   :  { %383 = vmatpush.msrb.mxu1 %v141_v58  ;;  %v157_v41 = vld [vmem:[#allocation2 + $0x218] sm:$0xff]  ;;  %v107_v44 = vld [vmem:[#allocation2 + $0x88] sm:$0xff]  ;;  %v100_v47 = vld [vmem:[#allocation2 + $0x50] sm:$0xff] }
  0x2d   :  { %250 = vmatpush.msra.mxu0 %v90_v60  ;;  %320 = vmatpush.msra.mxu2 %v91_v61  ;;  %v70_v46 = vld [vmem:[#allocation7 + $0x50] sm:$0xff]  ;;  %v93_v50 = vld [vmem:[#allocation2 + $0x18] sm:$0xff]  ;;  %v136_v51 = vld [vmem:[#allocation2 + $0x170] sm:$0xff] }
  0x2e   :  { %790 = vmatmul.msk.f32.gmra.mxu1 %vm216_vm0, %v1026_v43  ;;  %797 = vmatmul.msk.f32.gmra.mxu3 %vm216_vm0, %v1036_v59  ;;  %v143_v48 = vld [vmem:[#allocation2 + $0x1a8] sm:$0xff]  ;;  %v1087_v49 = vmul.f32 %v1033_v53, %v70_v46  ;;  %v200_v52 = vld [vmem:[#allocation2 + $0x370] sm:$0xff]  ;;  %v129_v54 = vld [vmem:[#allocation2 + $0x138] sm:$0xff] }
  0x2f   :  { %251 = vmatmul.f32.vlgmr.msra.gmra.mxu0 %v1039_v62  ;;  %321 = vmatmul.f32.vlgmr.msra.gmra.mxu2 %v1039_v62  ;;  %v193_v55 = vld [vmem:[#allocation2 + $0x338] sm:$0xff]  ;;  %v122_v53 = vld [vmem:[#allocation2 + $0x100] sm:$0xff]  ;;  %v115_v58 = vld [vmem:[#allocation2 + $0xc8] sm:$0xff] }
  0x30   :  { %354 = vmatpush.msrb.mxu2 %v997_v3  ;;  %384 = vmatpush.msrb.mxu1 %v134_v63  ;;  %v177_v3 = vld [vmem:[#allocation2 + $0x2b8] sm:$0xff]  ;;  %v186_v56 = vld [vmem:[#allocation2 + $0x300] sm:$0xff]  ;;  %v179_v60 = vld [vmem:[#allocation2 + $0x2c8] sm:$0xff] }
  0x31   :  { %445 = vmatpush.msrb.mxu0 %v198_v0  ;;  %v214_v57 = vld [vmem:[#allocation2 + $0x3e0] sm:$0xff]  ;;  %v108_v61 = vld [vmem:[#allocation2 + $0x90] sm:$0xff]  ;;  %v101_v0 = vld [vmem:[#allocation2 + $0x58] sm:$0xff] }
  0x32   :  { %385 = vmatpush.msrb.mxu1 %v127_v2  ;;  %355 = vmatpush.msrb.mxu2 %v1000_v7  ;;  %v106_v7 = vld [vmem:[#allocation2 + $0x80] sm:$0xff]  ;;  %v172_v63 = vld [vmem:[#allocation2 + $0x290] sm:$0xff]  ;;  %v165_v1 = vld [vmem:[#allocation2 + $0x258] sm:$0xff] }
  0x33   :  { %446 = vmatpush.msrb.mxu0 %v191_v5  ;;  %v94_v2 = vld [vmem:[#allocation2 + $0x20] sm:$0xff]  ;;  %v201_v5 = vld [vmem:[#allocation2 + $0x378] sm:$0xff]  ;;  %v144_v12 = vld [vmem:[#allocation2 + $0x1b0] sm:$0xff] }
  0x34   :  { %386 = vmatpush.msrb.mxu1 %v120_v6  ;;  %494 = vmatpush.msra.mxu2 %v212_v32  ;;  %v158_v4 = vld [vmem:[#allocation2 + $0x220] sm:$0xff]  ;;  %v207_v6 = vld [vmem:[#allocation2 + $0x3a8] sm:$0xff]  ;;  %v180_v14 = vld [vmem:[#allocation2 + $0x2d0] sm:$0xff] }
  0x35   :  { %447 = vmatpush.msrb.mxu0 %v184_v9  ;;  %v151_v9 = vld [vmem:[#allocation2 + $0x1e8] sm:$0xff]  ;;  %v109_v24 = vld [vmem:[#allocation2 + $0x98] sm:$0xff]  ;;  %v110_v35 = vld [vmem:[#allocation2 + $0xa0] sm:$0xff] }
  0x36   :  { %791 = vmatmul.msk.f32.gmra.mxu1 %vm216_vm0, %v1036_v59  ;;  %798 = vmatmul.msk.f32.gmra.mxu3 %vm216_vm0, %v1049_v8  ;;  %v131_v32 = vld [vmem:[#allocation2 + $0x148] sm:$0xff] }
  0x37   :  { %254 = vmatmul.f32.gmra.mxu0 %v1053_v10  ;;  %324 = vmatmul.f32.gmra.mxu2 %v1053_v10 }
  0x38   :  { %387 = vmatpush.msrb.mxu1 %v113_v11  ;;  %448 = vmatpush.msrb.mxu0 %v177_v3  ;;  %v208_v11 = vld [vmem:[#allocation2 + $0x3b0] sm:$0xff]  ;;  %v194_v3 = vld [vmem:[#allocation2 + $0x340] sm:$0xff] }
  0x39   :  { %495 = vmatpush.msra.mxu2 %v205_v36  ;;  %v103_v36 = vld [vmem:[#allocation2 + $0x68] sm:$0xff] }
  0x3a   :  { %388 = vmatpush.msrb.mxu1 %v106_v7  ;;  %449 = vmatpush.msrb.mxu0 %v170_v13  ;;  %v187_v7 = vld [vmem:[#allocation2 + $0x308] sm:$0xff]  ;;  %v137_v13 = vld [vmem:[#allocation2 + $0x178] sm:$0xff] }
  0x3c   :  { %389 = vmatpush.msrb.mxu1 %v99_v15  ;;  %450 = vmatpush.msrb.mxu0 %v163_v16  ;;  %v130_v15 = vld [vmem:[#allocation2 + $0x140] sm:$0xff]  ;;  %v173_v16 = vld [vmem:[#allocation2 + $0x298] sm:$0xff] }
  0x3e   :  { %792 = vmatmul.msk.f32.gmra.mxu1 %vm216_vm0, %v1049_v8  ;;  %799 = vmatmul.msk.f32.vlgmr.msrb.gmra.mxu3 %vm216_vm0, %v1009_v17 }
  0x3f   :  { %257 = vmatmul.f32.gmra.mxu0 %v1062_v19  ;;  %327 = vmatmul.f32.gmra.mxu2 %v1062_v19 }
  0x40   :  { %390 = vmatpush.msrb.mxu1 %v92_v20  ;;  %451 = vmatpush.msrb.mxu0 %v156_v21  ;;  %v123_v20 = vld [vmem:[#allocation2 + $0x108] sm:$0xff]  ;;  %v166_v21 = vld [vmem:[#allocation2 + $0x260] sm:$0xff] }
  0x41   :  { %704 = vmatpush.msrb.mxu3 %v215_v42 }
  0x42   :  { %515 = vmatpush.msra.mxu1 %v199_v22  ;;  %452 = vmatpush.msrb.mxu0 %v149_v23  ;;  %v116_v22 = vld [vmem:[#allocation2 + $0xd0] sm:$0xff]  ;;  %v159_v23 = vld [vmem:[#allocation2 + $0x228] sm:$0xff] }
  0x43   :  { %705 = vmatpush.msrb.mxu3 %v208_v11 }
  0x44   :  { %516 = vmatpush.msra.mxu1 %v192_v25  ;;  %453 = vmatpush.msrb.mxu0 %v142_v26  ;;  %v152_v25 = vld [vmem:[#allocation2 + $0x1f0] sm:$0xff]  ;;  %v102_v26 = vld [vmem:[#allocation2 + $0x60] sm:$0xff] }
  0x46   :  { %517 = vmatpush.msra.mxu1 %v185_v27  ;;  %800 = vmatmul.msk.f32.gmra.mxu3 %vm216_vm0, %v1012_v18  ;;  %v145_v27 = vld [vmem:[#allocation2 + $0x1b8] sm:$0xff] }
  0x47   :  { %391 = vmatmul.f32.vlgmr.msrb.gmra.mxu1 %v1039_v62  ;;  %260 = vmatmul.f32.gmra.mxu0 %v1071_v28 }
  0x48   :  { %330 = vmatmul.f32.gmra.mxu2 %v1071_v28  ;;  %454 = vmatpush.msrb.mxu0 %v135_v30  ;;  %v95_v30 = vld [vmem:[#allocation2 + $0x28] sm:$0xff] }
  0x49   :  { %518 = vmatpush.msra.mxu1 %v178_v31  ;;  %v138_v31 = vld [vmem:[#allocation2 + $0x180] sm:$0xff] }
  0x4a   :  { %455 = vmatpush.msrb.mxu0 %v128_v33  ;;  %v124_v33 = vld [vmem:[#allocation2 + $0x110] sm:$0xff] }
  0x4b   :  { %519 = vmatpush.msra.mxu1 %v171_v34  ;;  %v117_v34 = vld [vmem:[#allocation2 + $0xd8] sm:$0xff] }
  0x4c   :  { %456 = vmatpush.msrb.mxu0 %v121_v37  ;;  %v96_v37 = vld [vmem:[#allocation2 + $0x30] sm:$0xff] }
  0x4d   :  { %520 = vmatpush.msra.mxu1 %v164_v38 }
  0x4e   :  { %801 = vmatmul.msk.f32.gmra.mxu3 %vm216_vm0, %v1019_v29  ;;  %457 = vmatpush.msrb.mxu0 %v114_v40 }
  0x4f   :  { %394 = vmatmul.f32.gmra.mxu1 %v1053_v10  ;;  %263 = vmatmul.f32.gmra.mxu0 %v1079_v39 }
  0x50   :  { %333 = vmatmul.f32.gmra.mxu2 %v1079_v39  ;;  %521 = vmatpush.msra.mxu1 %v157_v41 }
  0x51   :  { %458 = vmatpush.msrb.mxu0 %v107_v44 }
  0x52   :  { %522 = vmatpush.msra.mxu1 %v150_v45 }
  0x53   :  { %459 = vmatpush.msrb.mxu0 %v100_v47 }
  0x54   :  { %523 = vmatpush.msra.mxu1 %v143_v48 }
  0x55   :  { %460 = vmatpush.msrb.mxu0 %v93_v50 }
  0x56   :  { %802 = vmatmul.msk.f32.gmra.mxu3 %vm216_vm0, %v1026_v43  ;;  %524 = vmatpush.msra.mxu1 %v136_v51 }
  0x57   :  { %397 = vmatmul.f32.gmra.mxu1 %v1062_v19  ;;  %266 = vmatmul.f32.gmra.mxu0 %v1087_v49 }
  0x58   :  { %336 = vmatmul.f32.gmra.mxu2 %v1087_v49  ;;  %585 = vmatpush.msra.mxu0 %v200_v52 }
  0x59   :  { %525 = vmatpush.msra.mxu1 %v129_v54 }
  0x5a   :  { %586 = vmatpush.msra.mxu0 %v193_v55 }
  0x5b   :  { %526 = vmatpush.msra.mxu1 %v122_v53 }
  0x5c   :  { %587 = vmatpush.msra.mxu0 %v186_v56 }
  0x5d   :  { %527 = vmatpush.msra.mxu1 %v115_v58 }
  0x5e   :  { %803 = vmatmul.msk.f32.gmra.mxu3 %vm216_vm0, %v1036_v59  ;;  %588 = vmatpush.msra.mxu0 %v179_v60 }
  0x5f   :  { %400 = vmatmul.f32.gmra.mxu1 %v1071_v28  ;;  %461 = vmatmul.f32.vlgmr.msrb.gmra.mxu0 %v1039_v62 }
  0x60   :  { %793 = vmatmul.msk.f32.vlgmr.msrb.gmra.mxu2 %vm216_vm0, %v1009_v17  ;;  %528 = vmatpush.msra.mxu1 %v108_v61 }
  0x61   :  { %634 = vmatpush.msrb.mxu2 %v214_v57  ;;  %589 = vmatpush.msra.mxu0 %v172_v63 }
  0x62   :  { %529 = vmatpush.msra.mxu1 %v101_v0 }
  0x63   :  { %590 = vmatpush.msra.mxu0 %v165_v1  ;;  %635 = vmatpush.msrb.mxu2 %v207_v6 }
  0x64   :  { %530 = vmatpush.msra.mxu1 %v94_v2 }
  0x65   :  { %591 = vmatpush.msra.mxu0 %v158_v4 }
  0x66   :  { %804 = vmatmul.msk.f32.gmra.mxu3 %vm216_vm0, %v1049_v8  ;;  %831 = vmatpush.msrb.mxu1 %v201_v5 }
  0x67   :  { %403 = vmatmul.f32.gmra.mxu1 %v1079_v39  ;;  %464 = vmatmul.f32.gmra.mxu0 %v1053_v10 }
  0x68   :  { %805 = vmatmul.msk.f32.vlgmr.msra.gmra.mxu2 %vm216_vm0, %v1009_v17  ;;  %592 = vmatpush.msra.mxu0 %v151_v9 }
  0x69   :  { %832 = vmatpush.msrb.mxu1 %v194_v3 }
  0x6a   :  { %593 = vmatpush.msra.mxu0 %v144_v12 }
  0x6b   :  { %833 = vmatpush.msrb.mxu1 %v187_v7 }
  0x6c   :  { %594 = vmatpush.msra.mxu0 %v137_v13 }
  0x6d   :  { %834 = vmatpush.msrb.mxu1 %v180_v14 }
  0x6e   :  { %811 = vmatmul.msk.f32.vlgmr.msra.gmra.mxu3 %vm216_vm0, %v1009_v17  ;;  %595 = vmatpush.msra.mxu0 %v130_v15 }
  0x6f   :  { %406 = vmatmul.f32.gmra.mxu1 %v1087_v49  ;;  %467 = vmatmul.f32.gmra.mxu0 %v1062_v19 }
  0x70   :  { %806 = vmatmul.msk.f32.gmra.mxu2 %vm216_vm0, %v1012_v18  ;;  %835 = vmatpush.msrb.mxu1 %v173_v16 }
  0x71   :  { %596 = vmatpush.msra.mxu0 %v123_v20 }
  0x72   :  { %836 = vmatpush.msrb.mxu1 %v166_v21 }
  0x73   :  { %597 = vmatpush.msra.mxu0 %v116_v22 }
  0x74   :  { %837 = vmatpush.msrb.mxu1 %v159_v23 }
  0x75   :  { %598 = vmatpush.msra.mxu0 %v109_v24 }
  0x76   :  { %812 = vmatmul.msk.f32.gmra.mxu3 %vm216_vm0, %v1012_v18  ;;  %838 = vmatpush.msrb.mxu1 %v152_v25 }
  0x77   :  { %531 = vmatmul.f32.vlgmr.msra.gmra.mxu1 %v1039_v62  ;;  %470 = vmatmul.f32.gmra.mxu0 %v1071_v28 }
  0x78   :  { %807 = vmatmul.msk.f32.gmra.mxu2 %vm216_vm0, %v1019_v29  ;;  %599 = vmatpush.msra.mxu0 %v102_v26 }
  0x79   :  { %839 = vmatpush.msrb.mxu1 %v145_v27 }
  0x7a   :  { %600 = vmatpush.msra.mxu0 %v95_v30 }
  0x7b   :  { %840 = vmatpush.msrb.mxu1 %v138_v31 }
  0x7c   :  { %655 = vmatpush.msrb.mxu0 %v201_v5 }
  0x7d   :  { %841 = vmatpush.msrb.mxu1 %v131_v32 }
  0x7e   :  { %813 = vmatmul.msk.f32.gmra.mxu3 %vm216_vm0, %v1019_v29  ;;  %656 = vmatpush.msrb.mxu0 %v194_v3 }
  0x7f   :  { %534 = vmatmul.f32.gmra.mxu1 %v1053_v10  ;;  %473 = vmatmul.f32.gmra.mxu0 %v1079_v39 }
  0x80   :  { %808 = vmatmul.msk.f32.gmra.mxu2 %vm216_vm0, %v1026_v43  ;;  %842 = vmatpush.msrb.mxu1 %v124_v33 }
  0x81   :  { %657 = vmatpush.msrb.mxu0 %v187_v7 }
  0x82   :  { %843 = vmatpush.msrb.mxu1 %v117_v34 }
  0x83   :  { %658 = vmatpush.msrb.mxu0 %v180_v14 }
  0x84   :  { %844 = vmatpush.msrb.mxu1 %v110_v35 }
  0x85   :  { %659 = vmatpush.msrb.mxu0 %v173_v16 }
  0x86   :  { %814 = vmatmul.msk.f32.gmra.mxu3 %vm216_vm0, %v1026_v43  ;;  %845 = vmatpush.msrb.mxu1 %v103_v36 }
  0x87   :  { %537 = vmatmul.f32.gmra.mxu1 %v1062_v19  ;;  %476 = vmatmul.f32.gmra.mxu0 %v1087_v49 }
  0x88   :  { %809 = vmatmul.msk.f32.gmra.mxu2 %vm216_vm0, %v1036_v59  ;;  %660 = vmatpush.msrb.mxu0 %v166_v21 }
  0x89   :  { %846 = vmatpush.msrb.mxu1 %v96_v37 }
  0x8a   :  { %661 = vmatpush.msrb.mxu0 %v159_v23 }
  0x8c   :  { %662 = vmatpush.msrb.mxu0 %v152_v25 }
  0x8e   :  { %815 = vmatmul.msk.f32.gmra.mxu3 %vm216_vm0, %v1036_v59  ;;  %663 = vmatpush.msrb.mxu0 %v145_v27 }
  0x8f   :  { %540 = vmatmul.f32.gmra.mxu1 %v1071_v28  ;;  %601 = vmatmul.f32.vlgmr.msra.gmra.mxu0 %v1039_v62 }
  0x90   :  { %810 = vmatmul.msk.f32.gmra.mxu2 %vm216_vm0, %v1049_v8  ;;  %664 = vmatpush.msrb.mxu0 %v138_v31 }
  0x92   :  { %665 = vmatpush.msrb.mxu0 %v131_v32 }
  0x93   :  { %v287_v38 = vpop.f32.mrf.mxu1 }
  0x94   :  { %666 = vmatpush.msrb.mxu0 %v124_v33 }
  0x96   :  { %816 = vmatmul.msk.f32.gmra.mxu3 %vm216_vm0, %v1049_v8  ;;  %667 = vmatpush.msrb.mxu0 %v117_v34 }
  0x97   :  { %543 = vmatmul.f32.gmra.mxu1 %v1079_v39  ;;  %604 = vmatmul.f32.gmra.mxu0 %v1053_v10 }
  0x98   :  { %817 = vmatmul.msk.f32.vlgmr.msrb.gmra.mxu2 %vm216_vm0, %v1009_v17  ;;  %668 = vmatpush.msrb.mxu0 %v110_v35 }
  0x99   :  { %v360_v40 = vpop.f32.mrf.mxu3 }
  0x9a   :  { %669 = vmatpush.msrb.mxu0 %v103_v36 }
  0x9b   :  { %v290_v41 = vpop.f32.mrf.mxu1 }
  0x9c   :  { %670 = vmatpush.msrb.mxu0 %v96_v37 }
  0x9e   :  { %823 = vmatmul.msk.f32.vlgmr.msrb.gmra.mxu3 %vm216_vm0, %v1009_v17 }
  0x9f   :  { %546 = vmatmul.f32.gmra.mxu1 %v1087_v49  ;;  %607 = vmatmul.f32.gmra.mxu0 %v1062_v19 }
  0xa0   :  { %818 = vmatmul.msk.f32.gmra.mxu2 %vm216_vm0, %v1012_v18 }
  0xa1   :  { %v363_v42 = vpop.f32.mrf.mxu3 }
  0xa3   :  { %v293_v44 = vpop.f32.mrf.mxu1 }
  0xa6   :  { %824 = vmatmul.msk.f32.gmra.mxu3 %vm216_vm0, %v1012_v18 }
  0xa7   :  { %674 = vmatmul.f32.vlgmr.msrb.gmra.mxu1 %v1053_v10  ;;  %610 = vmatmul.f32.gmra.mxu0 %v1071_v28 }
  0xa8   :  { %819 = vmatmul.msk.f32.gmra.mxu2 %vm216_vm0, %v1019_v29 }
  0xa9   :  { %v366_v17 = vpop.f32.mrf.mxu3 }
  0xab   :  { %v296_v45 = vpop.f32.mrf.mxu1 }
  0xac   :  { %v252_v46 = vpop.f32.mrf.mxu0 }
  0xad   :  { %v288_v47 = vadd.f32 %v287_v38, %v252_v46 }
  0xae   :  { %825 = vmatmul.msk.f32.gmra.mxu3 %vm216_vm0, %v1019_v29 }
  0xaf   :  { %677 = vmatmul.f32.gmra.mxu1 %v1062_v19  ;;  %725 = vst [vmem:[#allocation8] sm:$0xff] %v288_v47  ;;  %613 = vmatmul.f32.gmra.mxu0 %v1079_v39 }
  0xb0   :  { %820 = vmatmul.msk.f32.gmra.mxu2 %vm216_vm0, %v1026_v43 }
  0xb1   :  { %v369_v18 = vpop.f32.mrf.mxu3 }
  0xb2   :  { %v1160_v10 = vpop.f32.mrf.mxu2 }
  0xb3   :  { %v299_v48 = vpop.f32.mrf.mxu1 }
  0xb4   :  { %v255_v50 = vpop.f32.mrf.mxu0 }
  0xb5   :  { %v291_v51 = vadd.f32 %v290_v41, %v255_v50 }
  0xb6   :  { %826 = vmatmul.msk.f32.gmra.mxu3 %vm216_vm0, %v1026_v43 }
  0xb7   :  { %680 = vmatmul.f32.gmra.mxu1 %v1071_v28  ;;  %732 = vst [vmem:[#allocation8 + $0x38] sm:$0xff] %v291_v51  ;;  %616 = vmatmul.f32.gmra.mxu0 %v1087_v49 }
  0xb8   :  { %821 = vmatmul.msk.f32.gmra.mxu2 %vm216_vm0, %v1036_v59 }
  0xb9   :  { %v372_v29 = vpop.f32.mrf.mxu3 }
  0xba   :  { %v325_v19 = vpop.f32.mrf.mxu2 }
  0xbb   :  { %v302_v52 = vpop.f32.mrf.mxu1  ;;  %v361_v54 = vadd.f32 %v360_v40, %v325_v19 }
  0xbc   :  { %v258_v55 = vpop.f32.mrf.mxu0 }
  0xbd   :  { %733 = vst [vmem:[#allocation8 + $0x40] sm:$0xff] %v361_v54  ;;  %v294_v53 = vadd.f32 %v293_v44, %v258_v55 }
  0xbe   :  { %827 = vmatmul.msk.f32.gmra.mxu3 %vm216_vm0, %v1036_v59 }
  0xbf   :  { %683 = vmatmul.f32.gmra.mxu1 %v1079_v39  ;;  %739 = vst [vmem:[#allocation8 + $0x70] sm:$0xff] %v294_v53  ;;  %671 = vmatmul.f32.vlgmr.msrb.gmra.mxu0 %v1039_v62 }
  0xc0   :  { %822 = vmatmul.msk.f32.gmra.mxu2 %vm216_vm0, %v1049_v8 }
  0xc1   :  { %v427_v43 = vpop.f32.mrf.mxu3 }
  0xc2   :  { %v328_v28 = vpop.f32.mrf.mxu2 }
  0xc3   :  { %v364_v57 = vadd.f32 %v363_v42, %v328_v28 }
  0xc4   :  { %v392_v56 = vpop.f32.mrf.mxu1  ;;  %v261_v60 = vpop.f32.mrf.mxu0 }
  0xc5   :  { %v428_v58 = vadd.f32 %v427_v43, %v392_v56  ;;  %740 = vst [vmem:[#allocation8 + $0x78] sm:$0xff] %v364_v57  ;;  %v297_v61 = vadd.f32 %v296_v45, %v261_v60 }
  0xc6   :  { %828 = vmatmul.msk.f32.gmra.mxu3 %vm216_vm0, %v1049_v8 }
  0xc7   :  { %727 = vst [vmem:[#allocation8 + $0x10] sm:$0xff] %v428_v58  ;;  %686 = vmatmul.f32.gmra.mxu1 %v1087_v49 }
  0xc8   :  { %746 = vst [vmem:[#allocation8 + $0xa8] sm:$0xff] %v297_v61 }
  0xc9   :  { %v430_v59 = vpop.f32.mrf.mxu3 }
  0xcb   :  { %v331_v39 = vpop.f32.mrf.mxu2 }
  0xcc   :  { %v395_v63 = vpop.f32.mrf.mxu1  ;;  %v367_v0 = vadd.f32 %v366_v17, %v331_v39  ;;  %v264_v1 = vpop.f32.mrf.mxu0 }
  0xcd   :  { %v431_v62 = vadd.f32 %v430_v59, %v395_v63  ;;  %v300_v2 = vadd.f32 %v299_v48, %v264_v1 }
  0xce   :  { %747 = vst [vmem:[#allocation8 + $0xb0] sm:$0xff] %v367_v0 }
  0xcf   :  { %734 = vst [vmem:[#allocation8 + $0x48] sm:$0xff] %v431_v62 }
  0xd0   :  { %753 = vst [vmem:[#allocation8 + $0xe0] sm:$0xff] %v300_v2 }
  0xd1   :  { %v433_v4 = vpop.f32.mrf.mxu3 }
  0xd3   :  { %v334_v5 = vpop.f32.mrf.mxu2 }
  0xd4   :  { %v398_v6 = vpop.f32.mrf.mxu1  ;;  %v370_v9 = vadd.f32 %v369_v18, %v334_v5  ;;  %v267_v3 = vpop.f32.mrf.mxu0 }
  0xd5   :  { %v434_v11 = vadd.f32 %v433_v4, %v398_v6  ;;  %v303_v8 = vadd.f32 %v302_v52, %v267_v3 }
  0xd6   :  { %754 = vst [vmem:[#allocation8 + $0xe8] sm:$0xff] %v370_v9 }
  0xd7   :  { %741 = vst [vmem:[#allocation8 + $0x80] sm:$0xff] %v434_v11 }
  0xd8   :  { %760 = vst [vmem:[#allocation8 + $0x118] sm:$0xff] %v303_v8 }
  0xd9   :  { %v436_v49 = vpop.f32.mrf.mxu3 }
  0xdb   :  { %v337_v12 = vpop.f32.mrf.mxu2 }
  0xdc   :  { %v401_v7 = vpop.f32.mrf.mxu1  ;;  %v373_v13 = vadd.f32 %v372_v29, %v337_v12  ;;  %v462_v15 = vpop.f32.mrf.mxu0 }
  0xdd   :  { %v437_v14 = vadd.f32 %v436_v49, %v401_v7 }
  0xde   :  { %761 = vst [vmem:[#allocation8 + $0x120] sm:$0xff] %v373_v13 }
  0xdf   :  { %748 = vst [vmem:[#allocation8 + $0xb8] sm:$0xff] %v437_v14 }
  0xe1   :  { %v439_v16 = vpop.f32.mrf.mxu3 }
  0xe3   :  { %v357_v20 = vpop.f32.mrf.mxu2 }
  0xe4   :  { %v404_v21 = vpop.f32.mrf.mxu1  ;;  %v358_v22 = vadd.f32 %v357_v20, %v1160_v10  ;;  %v465_v24 = vpop.f32.mrf.mxu0 }
  0xe5   :  { %v440_v23 = vadd.f32 %v439_v16, %v404_v21 }
  0xe6   :  { %726 = vst [vmem:[#allocation8 + $0x8] sm:$0xff] %v358_v22 }
  0xe7   :  { %755 = vst [vmem:[#allocation8 + $0xf0] sm:$0xff] %v440_v23 }
  0xe9   :  { %v442_v25 = vpop.f32.mrf.mxu3 }
  0xeb   :  { %v497_v26 = vpop.f32.mrf.mxu2 }
  0xec   :  { %v407_v27 = vpop.f32.mrf.mxu1  ;;  %v498_v30 = vadd.f32 %v497_v26, %v462_v15  ;;  %v468_v32 = vpop.f32.mrf.mxu0 }
  0xed   :  { %v443_v31 = vadd.f32 %v442_v25, %v407_v27 }
  0xee   :  { %728 = vst [vmem:[#allocation8 + $0x18] sm:$0xff] %v498_v30 }
  0xef   :  { %762 = vst [vmem:[#allocation8 + $0x128] sm:$0xff] %v443_v31 }
  0xf1   :  { %v567_v33 = vpop.f32.mrf.mxu3 }
  0xf3   :  { %v500_v34 = vpop.f32.mrf.mxu2 }
  0xf4   :  { %v532_v35 = vpop.f32.mrf.mxu1  ;;  %v501_v36 = vadd.f32 %v500_v34, %v465_v24  ;;  %v471_v38 = vpop.f32.mrf.mxu0 }
  0xf5   :  { %v568_v37 = vadd.f32 %v567_v33, %v532_v35 }
  0xf6   :  { %735 = vst [vmem:[#allocation8 + $0x50] sm:$0xff] %v501_v36 }
  0xf7   :  { %729 = vst [vmem:[#allocation8 + $0x20] sm:$0xff] %v568_v37 }
  0xf9   :  { %v570_v40 = vpop.f32.mrf.mxu3 }
  0xfb   :  { %v503_v41 = vpop.f32.mrf.mxu2 }
  0xfc   :  { %v535_v42 = vpop.f32.mrf.mxu1  ;;  %v504_v44 = vadd.f32 %v503_v41, %v468_v32  ;;  %v474_v45 = vpop.f32.mrf.mxu0 }
  0xfd   :  { %v571_v17 = vadd.f32 %v570_v40, %v535_v42 }
  0xfe   :  { %742 = vst [vmem:[#allocation8 + $0x88] sm:$0xff] %v504_v44 }
  0xff   :  { %736 = vst [vmem:[#allocation8 + $0x58] sm:$0xff] %v571_v17 }
 0x101   :  { %v573_v46 = vpop.f32.mrf.mxu3 }
 0x103   :  { %v506_v47 = vpop.f32.mrf.mxu2 }
 0x104   :  { %v538_v18 = vpop.f32.mrf.mxu1  ;;  %v507_v10 = vadd.f32 %v506_v47, %v471_v38  ;;  %v477_v50 = vpop.f32.mrf.mxu0 }
 0x105   :  { %v574_v48 = vadd.f32 %v573_v46, %v538_v18 }
 0x106   :  { %749 = vst [vmem:[#allocation8 + $0xc0] sm:$0xff] %v507_v10 }
 0x107   :  { %743 = vst [vmem:[#allocation8 + $0x90] sm:$0xff] %v574_v48 }
 0x109   :  { %v576_v51 = vpop.f32.mrf.mxu3 }
 0x10b   :  { %v509_v29 = vpop.f32.mrf.mxu2 }
 0x10c   :  { %v541_v19 = vpop.f32.mrf.mxu1  ;;  %v510_v52 = vadd.f32 %v509_v29, %v474_v45  ;;  %v602_v55 = vpop.f32.mrf.mxu0 }
 0x10d   :  { %v577_v54 = vadd.f32 %v576_v51, %v541_v19 }
 0x10e   :  { %756 = vst [vmem:[#allocation8 + $0xf8] sm:$0xff] %v510_v52 }
 0x10f   :  { %750 = vst [vmem:[#allocation8 + $0xc8] sm:$0xff] %v577_v54 }
 0x111   :  { %v579_v53 = vpop.f32.mrf.mxu3 }
 0x113   :  { %v512_v43 = vpop.f32.mrf.mxu2 }
 0x114   :  { %v544_v28 = vpop.f32.mrf.mxu1  ;;  %v513_v56 = vadd.f32 %v512_v43, %v477_v50  ;;  %v605_v58 = vpop.f32.mrf.mxu0 }
 0x115   :  { %v580_v57 = vadd.f32 %v579_v53, %v544_v28 }
 0x116   :  { %763 = vst [vmem:[#allocation8 + $0x130] sm:$0xff] %v513_v56 }
 0x117   :  { %757 = vst [vmem:[#allocation8 + $0x100] sm:$0xff] %v580_v57 }
 0x119   :  { %v582_v60 = vpop.f32.mrf.mxu3 }
 0x11b   :  { %v637_v61 = vpop.f32.mrf.mxu2 }
 0x11c   :  { %v547_v59 = vpop.f32.mrf.mxu1  ;;  %v638_v39 = vadd.f32 %v637_v61, %v602_v55  ;;  %v608_v0 = vpop.f32.mrf.mxu0 }
 0x11d   :  { %v583_v63 = vadd.f32 %v582_v60, %v547_v59 }
 0x11e   :  { %730 = vst [vmem:[#allocation8 + $0x28] sm:$0xff] %v638_v39 }
 0x11f   :  { %764 = vst [vmem:[#allocation8 + $0x138] sm:$0xff] %v583_v63 }
 0x121   :  { %v707_v62 = vpop.f32.mrf.mxu3 }
 0x123   :  { %v640_v1 = vpop.f32.mrf.mxu2 }
 0x124   :  { %v641_v2 = vadd.f32 %v640_v1, %v605_v58  ;;  %v675_v4 = vpop.f32.mrf.mxu1  ;;  %v611_v5 = vpop.f32.mrf.mxu0 }
 0x126   :  { %737 = vst [vmem:[#allocation8 + $0x60] sm:$0xff] %v641_v2 }
 0x129   :  { %v710_v6 = vpop.f32.mrf.mxu3 }
 0x12a   :  { %v711_v9 = vadd.f32 %v710_v6, %v675_v4 }
 0x12b   :  { %v643_v11 = vpop.f32.mrf.mxu2 }
 0x12c   :  { %v644_v3 = vadd.f32 %v643_v11, %v608_v0  ;;  %v678_v8 = vpop.f32.mrf.mxu1  ;;  %738 = vst.msk [vmem:[#allocation8 + $0x68] sm:$0xff] %vm216_vm0, %v711_v9  ;;  %v614_v49 = vpop.f32.mrf.mxu0 }
 0x12e   :  { %744 = vst [vmem:[#allocation8 + $0x98] sm:$0xff] %v644_v3 }
 0x131   :  { %v713_v12 = vpop.f32.mrf.mxu3 }
 0x132   :  { %v714_v7 = vadd.f32 %v713_v12, %v678_v8 }
 0x133   :  { %v646_v13 = vpop.f32.mrf.mxu2 }
 0x134   :  { %v647_v14 = vadd.f32 %v646_v13, %v611_v5  ;;  %v681_v15 = vpop.f32.mrf.mxu1  ;;  %745 = vst.msk [vmem:[#allocation8 + $0xa0] sm:$0xff] %vm216_vm0, %v714_v7  ;;  %v617_v16 = vpop.f32.mrf.mxu0 }
 0x136   :  { %751 = vst [vmem:[#allocation8 + $0xd0] sm:$0xff] %v647_v14 }
 0x139   :  { %v716_v20 = vpop.f32.mrf.mxu3 }
 0x13a   :  { %v717_v21 = vadd.f32 %v716_v20, %v681_v15 }
 0x13b   :  { %v649_v22 = vpop.f32.mrf.mxu2 }
 0x13c   :  { %v650_v23 = vadd.f32 %v649_v22, %v614_v49  ;;  %752 = vst.msk [vmem:[#allocation8 + $0xd8] sm:$0xff] %vm216_vm0, %v717_v21  ;;  %v672_v24 = vpop.f32.mrf.mxu0  ;;  %v684_v26 = vpop.f32.mrf.mxu1 }
 0x13d   :  { %v708_v25 = vadd.f32 %v707_v62, %v672_v24 }
 0x13e   :  { %758 = vst [vmem:[#allocation8 + $0x108] sm:$0xff] %v650_v23 }
 0x13f   :  { %731 = vst.msk [vmem:[#allocation8 + $0x30] sm:$0xff] %vm216_vm0, %v708_v25 }
 0x141   :  { %v719_v27 = vpop.f32.mrf.mxu3 }
 0x142   :  { %v720_v30 = vadd.f32 %v719_v27, %v684_v26 }
 0x143   :  { %v652_v31 = vpop.f32.mrf.mxu2 }
 0x144   :  { %v653_v32 = vadd.f32 %v652_v31, %v617_v16  ;;  %759 = vst.msk [vmem:[#allocation8 + $0x110] sm:$0xff] %vm216_vm0, %v720_v30  ;;  %v687_v33 = vpop.f32.mrf.mxu1 }
 0x146   :  { %765 = vst [vmem:[#allocation8 + $0x140] sm:$0xff] %v653_v32 }
 0x149   :  { %v722_v34 = vpop.f32.mrf.mxu3 }
 0x14a   :  { %v723_v35 = vadd.f32 %v722_v34, %v687_v33 }
 0x14c   :  { %766 = vst.msk [vmem:[#allocation8 + $0x148] sm:$0xff] %vm216_vm0, %v723_v35 }
 0x14d   :  { %779 = dma.vmem_to_hbm [thread:$0]  %s772_s29, 5376, %s774_s5, [#allocation4], %s959_s22, %s959_s22, %s960_s23  }
 0x14e   :  { %955 = dma.done.wait [#allocation4], 5376  }
 0x14f   :  { %956 = vsyncadd [#allocation4], 4294961920 }
 0x150   :  { %784 = vsyncpa [#allocation3], 1 }
 0x151   :  { %785 = vsyncpa [#allocation6], 1 }
 0x152   :  { %786 = vsyncpa [#allocation4], 1 }

</bundles_post_ra>
